<compile_context>
chip_gen: v6e
topology: v6e:2x2x1
jax: 0.10.0
libtpu: 0.0.40
codegen_flags: <defaults>
</compile_context>

<pallas_src>
import functools

import jax
import jax.numpy as jnp
from jax.experimental import pallas as pl
from jax.experimental.pallas import tpu as pltpu

# ----------------------- small synthetic BERT config -----------------------
CFG = dict(
    vocab=100,       # vocab size (synthetic)
    max_pos=16,      # max position embeddings
    type_vocab=2,
    hidden=32,       # bert-base: 768 -> scaled down
    heads=4,         # bert-base: 12
    layers=2,        # bert-base: 12
    inter=64,        # bert-base: 3072
    n_classes=3,
    seq=8,           # max_length
    batch=2,
)
LN_EPS = 1e-12     # BERT layer-norm eps
CLS_PAD = 128      # lane-dense padded width for the classifier-head output slab


# ----------------------------- in-kernel helpers -----------------------------
def _ln_rows(x, gamma, beta):
    """Row-wise LayerNorm; gamma/beta are (1, H) rows. Stats in f32, rsqrt on EUP."""
    mu = jnp.mean(x, axis=-1, keepdims=True)
    var = jnp.mean(jnp.square(x - mu), axis=-1, keepdims=True)
    return (x - mu) * jax.lax.rsqrt(var + LN_EPS) * gamma + beta


def _gelu(x):
    # tanh-approx GELU.  TODO(synk): HF bert-base uses exact erf GELU (~1e-3 drift).
    return 0.5 * x * (1.0 + jnp.tanh(0.7978845608028654 * (x + 0.044715 * x * x * x)))


# ------------------------------ Pallas kernels ------------------------------
def _emb_ln_kernel(x_ref, g_ref, b_ref, o_ref):
    """LayerNorm over the summed embeddings (token+pos+type done in plain JAX)."""
    x = x_ref[...].astype(jnp.float32)
    o_ref[...] = _ln_rows(x, g_ref[...], b_ref[...]).astype(o_ref.dtype)


def _encoder_layer_kernel(x_ref, m_ref, wqkv_ref, bqkv_ref, wo_ref, bo_ref,
                          w1_ref, b1_ref, w2_ref, b2_ref, ln_ref, o_ref,
                          *, heads, head_dim, scale):
    """One full BERT encoder layer for one batch element (grid axis = batch).

    Fuses: fused-QKV matmul -> per-head softmax attention -> output projection
    (accumulated per head) + bias + residual -> LN1 -> FFN (GELU) + bias + residual -> LN2.
    Everything stays in VMEM/vregs; a single (S, H) slab is read and written per step.
    """
    H = heads * head_dim
    x = x_ref[...].astype(jnp.float32)                                     # (S, H)

    # fused Q|K|V projection: one matmul with a 3H-wide N (fills the MXU better)
    qkv = jnp.dot(x, wqkv_ref[...], preferred_element_type=jnp.float32) + bqkv_ref[...]

    m = m_ref[0]                                                           # (1, S) additive mask

    # attention output projection accumulated per head:
    #   ctx @ wo + bo + x  ==  x + bo + sum_h ctx_h @ wo[h*D:(h+1)*D, :]
    attn = x + bo_ref[...]
    for h in range(heads):
        lo, hi = h * head_dim, (h + 1) * head_dim
        q = qkv[:, lo:hi]                                                  # (S, D)
        k = qkv[:, H + lo:H + hi]                                          # (S, D)
        v = qkv[:, 2 * H + lo:2 * H + hi]                                  # (S, D)
        s = jnp.dot(q, k.T, preferred_element_type=jnp.float32) * scale + m
        s = s - jnp.max(s, axis=-1, keepdims=True)
        p = jnp.exp(s)
        p = p * pl.reciprocal(jnp.sum(p, axis=-1, keepdims=True), approx=True)
        ctx = jnp.dot(p, v, preferred_element_type=jnp.float32)            # (S, D)
        attn = attn + jnp.dot(ctx, wo_ref[lo:hi, :],
                              preferred_element_type=jnp.float32)

    x1 = _ln_rows(attn, ln_ref[0:1, :], ln_ref[1:2, :])                    # residual + LN1

    h1 = _gelu(jnp.dot(x1, w1_ref[...], preferred_element_type=jnp.float32) + b1_ref[...])
    h2 = jnp.dot(h1, w2_ref[...], preferred_element_type=jnp.float32) + b2_ref[...] + x1
    o_ref[...] = _ln_rows(h2, ln_ref[2:3, :], ln_ref[3:4, :]).astype(o_ref.dtype)


def _pooler_head_kernel(x_ref, wp_ref, bp_ref, wc_ref, bc_ref, o_ref):
    """pooled = tanh([CLS] @ Wp + bp); dropout(p=0.3) is identity in eval;
    logits = pooled @ Wc_pad + bc_pad written as a lane-dense 128-wide slab."""
    pooled = jnp.tanh(jnp.dot(x_ref[...], wp_ref[...],
                              preferred_element_type=jnp.float32) + bp_ref[...])
    o_ref[...] = (jnp.dot(pooled, wc_ref[...], preferred_element_type=jnp.float32)
                  + bc_ref[...]).astype(o_ref.dtype)


# ------------------------------ kernel wrappers ------------------------------
def embedding_layernorm(x, gamma, beta):
    M, H = x.shape
    return pl.pallas_call(
        _emb_ln_kernel,
        out_shape=jax.ShapeDtypeStruct((M, H), jnp.float32),
        grid=(1,),
        in_specs=[
            pl.BlockSpec((M, H), lambda i: (0, 0)),
            pl.BlockSpec((1, H), lambda i: (0, 0)),
            pl.BlockSpec((1, H), lambda i: (0, 0)),
        ],
        out_specs=pl.BlockSpec((M, H), lambda i: (0, 0)),
    )(x, gamma, beta)


def encoder_layer(x, add_mask, lyr, *, batch, seq, heads):
    """One fused encoder layer. Grid over batch ('parallel' -> both v7x TCs get work);
    weights use constant block indices so they stay VMEM-resident across grid steps."""
    BS, H = x.shape
    D = H // heads
    I = lyr["w1"].shape[1]
    kernel = functools.partial(_encoder_layer_kernel, heads=heads, head_dim=D,
                               scale=1.0 / float(D) ** 0.5)

    def wspec(shape):
        return pl.BlockSpec(shape, lambda b: (0, 0))

    return pl.pallas_call(
        kernel,
        out_shape=jax.ShapeDtypeStruct((BS, H), jnp.float32),
        grid=(batch,),
        in_specs=[
            pl.BlockSpec((seq, H), lambda b: (b, 0)),          # this batch's rows
            pl.BlockSpec((1, 1, seq), lambda b: (b, 0, 0)),    # additive attention mask
            wspec((H, 3 * H)), wspec((1, 3 * H)),              # fused QKV
            wspec((H, H)), wspec((1, H)),                      # output proj
            wspec((H, I)), wspec((1, I)),                      # FFN up
            wspec((I, H)), wspec((1, H)),                      # FFN down
            wspec((4, H)),                                     # [ln1_g, ln1_b, ln2_g, ln2_b]
        ],
        out_specs=pl.BlockSpec((seq, H), lambda b: (b, 0)),
        compiler_params=pltpu.CompilerParams(dimension_semantics=("parallel",)),
    )(x, add_mask, lyr["wqkv"], lyr["bqkv"], lyr["wo"], lyr["bo"],
      lyr["w1"], lyr["b1"], lyr["w2"], lyr["b2"], lyr["ln"])


def pooler_head(cls_x, wp, bp, wc_pad, bc_pad):
    B, H = cls_x.shape
    NP = wc_pad.shape[1]
    return pl.pallas_call(
        _pooler_head_kernel,
        out_shape=jax.ShapeDtypeStruct((B, NP), jnp.float32),
        grid=(1,),
        in_specs=[
            pl.BlockSpec((B, H), lambda i: (0, 0)),
            pl.BlockSpec((H, H), lambda i: (0, 0)),
            pl.BlockSpec((1, H), lambda i: (0, 0)),
            pl.BlockSpec((H, NP), lambda i: (0, 0)),
            pl.BlockSpec((1, NP), lambda i: (0, 0)),
        ],
        out_specs=pl.BlockSpec((B, NP), lambda i: (0, 0)),
    )(cls_x, wp, bp, wc_pad, bc_pad)


# ------------------------------ parameter init ------------------------------
def init_params(key):
    c = CFG
    H, I = c["hidden"], c["inter"]

    def nrm(k, shape, scale=0.02):
        return scale * jax.random.normal(k, shape, dtype=jnp.float32)

    keys = iter(jax.random.split(key, 8 + 8 * c["layers"]))
    p = {
        "word_emb": nrm(next(keys), (c["vocab"], H)),
        "pos_emb": nrm(next(keys), (c["max_pos"], H)),
        "type_emb": nrm(next(keys), (c["type_vocab"], H)),
        # biases / LN params stored pre-reshaped (1, H) -> no per-call reshapes
        "emb_ln_g": jnp.ones((1, H), jnp.float32),
        "emb_ln_b": jnp.zeros((1, H), jnp.float32),
        "pooler_w": nrm(next(keys), (H, H)),
        "pooler_b": jnp.zeros((1, H), jnp.float32),
        # classifier head zero-padded to a lane-dense 128-wide slab (sliced outside)
        "cls_w_pad": jnp.zeros((H, CLS_PAD), jnp.float32)
                        .at[:, :c["n_classes"]].set(nrm(next(keys), (H, c["n_classes"]))),
        "cls_b_pad": jnp.zeros((1, CLS_PAD), jnp.float32),
        "layers": [],
    }
    for _ in range(c["layers"]):
        wq = nrm(next(keys), (H, H))
        wk = nrm(next(keys), (H, H))
        wv = nrm(next(keys), (H, H))
        lyr = {
            "wqkv": jnp.concatenate([wq, wk, wv], axis=1),      # fused (H, 3H) QKV weight
            "bqkv": jnp.zeros((1, 3 * H), jnp.float32),
            "wo": nrm(next(keys), (H, H)), "bo": jnp.zeros((1, H), jnp.float32),
            "w1": nrm(next(keys), (H, I)), "b1": jnp.zeros((1, I), jnp.float32),
            "w2": nrm(next(keys), (I, H)), "b2": jnp.zeros((1, H), jnp.float32),
            "ln": jnp.concatenate(
                [jnp.ones((1, H)), jnp.zeros((1, H)),
                 jnp.ones((1, H)), jnp.zeros((1, H))], axis=0).astype(jnp.float32),
        }
        p["layers"].append(lyr)
    return p


# ------------------------------ forward pass ------------------------------
def sentiment_classifier_forward(params, input_ids, attention_mask):
    c = CFG
    B, S = input_ids.shape
    H = c["hidden"]

    # ---- embeddings (gathers + adds are plain-JAX glue) + LayerNorm kernel ----
    tok = jnp.take(params["word_emb"], input_ids, axis=0)                  # (B, S, H)
    pos = params["pos_emb"][:S][None, :, :]                                # (1, S, H)
    typ = params["type_emb"][0][None, None, :]                             # token_type_ids = 0
    x = (tok + pos + typ).reshape(B * S, H)
    x = embedding_layernorm(x, params["emb_ln_g"], params["emb_ln_b"])     # (B*S, H)
    # embedding dropout: identity in eval mode

    # additive attention mask (HF convention 0 / -1e4), built once per batch;
    # broadcast over query rows and heads inside the fused layer kernel.
    add_mask = ((1.0 - attention_mask.astype(jnp.float32)) * -1e4).reshape(B, 1, S)

    for lyr in params["layers"]:
        x = encoder_layer(x, add_mask, lyr, batch=B, seq=S, heads=c["heads"])

    # ---- pooler(tanh on [CLS]) + Dropout(p=0.3, identity at eval) + Linear head ----
    cls_x = x.reshape(B, S, H)[:, 0, :]                                    # (B, H)
    logits_pad = pooler_head(cls_x, params["pooler_w"], params["pooler_b"],
                             params["cls_w_pad"], params["cls_b_pad"])     # (B, 128)
    return logits_pad[:, :c["n_classes"]]                                  # (B, n_classes)


# ---------------------------------- main ----------------------------------
if __name__ == "__main__":
    key = jax.random.PRNGKey(0)
    pkey, ikey = jax.random.split(key)

    params = init_params(pkey)

    B, S = CFG["batch"], CFG["seq"]
    input_ids = jax.random.randint(ikey, (B, S), minval=0, maxval=CFG["vocab"],
                                   dtype=jnp.int32)
    attention_mask = jnp.ones((B, S), dtype=jnp.int32)

    # TODO(synk): tokenizer.encode_plus pre-processing (string -> ids) has no Pallas
    # equivalent; ids/mask are provided directly, matching forward(input_ids, attention_mask).
    fwd = jax.jit(sentiment_classifier_forward)
    logits = fwd(params, input_ids, attention_mask)
    jax.block_until_ready(logits)
    assert logits.shape == (B, CFG["n_classes"])
    print("KERNEL_OK")
</pallas_src>

<mosaic_0001>
module attributes {stable_mosaic.version = 11 : i64} {
  func.func @_emb_ln_kernel(%arg0: i32, %arg1: memref<16x32xf32, #tpu.memory_space<vmem>>, %arg2: memref<1x32xf32, #tpu.memory_space<vmem>>, %arg3: memref<1x32xf32, #tpu.memory_space<vmem>>, %arg4: memref<16x32xf32, #tpu.memory_space<vmem>>) attributes {dimension_semantics = [#tpu.dimension_semantics<arbitrary>], iteration_bounds = array<i64: 1>, scalar_prefetch = 0 : i64, scratch_operands = 0 : i64, tpu.core_type = #tpu.core_type<tc>, window_params = [{pipeline_mode = #tpu.pipeline_mode<synchronous>, transform_indices = @transform_0, window_bounds = array<i64: 16, 32>}, {pipeline_mode = #tpu.pipeline_mode<synchronous>, transform_indices = @transform_1, window_bounds = array<i64: 1, 32>}, {pipeline_mode = #tpu.pipeline_mode<synchronous>, transform_indices = @transform_2, window_bounds = array<i64: 1, 32>}, {pipeline_mode = #tpu.pipeline_mode<synchronous>, transform_indices = @transform_3, window_bounds = array<i64: 16, 32>}]} {
    %c0 = arith.constant 0 : index
    %c0_0 = arith.constant 0 : index
    %0 = vector.load %arg1[%c0, %c0_0] : memref<16x32xf32, #tpu.memory_space<vmem>>, vector<16x32xf32>
    %c0_1 = arith.constant 0 : index
    %c0_2 = arith.constant 0 : index
    %1 = vector.load %arg2[%c0_1, %c0_2] : memref<1x32xf32, #tpu.memory_space<vmem>>, vector<1x32xf32>
    %c0_3 = arith.constant 0 : index
    %c0_4 = arith.constant 0 : index
    %2 = vector.load %arg3[%c0_3, %c0_4] : memref<1x32xf32, #tpu.memory_space<vmem>>, vector<1x32xf32>
    %cst = arith.constant dense<0.000000e+00> : vector<16xf32>
    %3 = vector.multi_reduction <add>, %0, %cst [1] : vector<16x32xf32> to vector<16xf32>
    %4 = vector.shape_cast %3 : vector<16xf32> to vector<16x1xf32>
    %cst_5 = arith.constant 3.200000e+01 : f32
    %5 = vector.broadcast %cst_5 : f32 to vector<16x1xf32>
    %6 = arith.divf %4, %5 : vector<16x1xf32>
    %7 = vector.broadcast %6 : vector<16x1xf32> to vector<16x32xf32>
    %8 = arith.subf %0, %7 : vector<16x32xf32>
    %9 = arith.mulf %8, %8 : vector<16x32xf32>
    %cst_6 = arith.constant dense<0.000000e+00> : vector<16xf32>
    %10 = vector.multi_reduction <add>, %9, %cst_6 [1] : vector<16x32xf32> to vector<16xf32>
    %11 = vector.shape_cast %10 : vector<16xf32> to vector<16x1xf32>
    %cst_7 = arith.constant 3.200000e+01 : f32
    %12 = vector.broadcast %cst_7 : f32 to vector<16x1xf32>
    %13 = arith.divf %11, %12 : vector<16x1xf32>
    %14 = vector.broadcast %6 : vector<16x1xf32> to vector<16x32xf32>
    %15 = arith.subf %0, %14 : vector<16x32xf32>
    %cst_8 = arith.constant 9.99999996E-13 : f32
    %16 = vector.broadcast %cst_8 : f32 to vector<16x1xf32>
    %17 = arith.addf %13, %16 : vector<16x1xf32>
    %18 = math.rsqrt %17 : vector<16x1xf32>
    %19 = vector.broadcast %18 : vector<16x1xf32> to vector<16x32xf32>
    %20 = arith.mulf %15, %19 : vector<16x32xf32>
    %21 = vector.broadcast %1 : vector<1x32xf32> to vector<16x32xf32>
    %22 = arith.mulf %20, %21 : vector<16x32xf32>
    %23 = vector.broadcast %2 : vector<1x32xf32> to vector<16x32xf32>
    %24 = arith.addf %22, %23 : vector<16x32xf32>
    %c0_9 = arith.constant 0 : index
    %c0_10 = arith.constant 0 : index
    %25 = vector.load %arg4[%c0_9, %c0_10] : memref<16x32xf32, #tpu.memory_space<vmem>>, vector<16x32xf32>
    tpu.vector_store %arg4[%c0_9, %c0_10], %24 {strides = array<i32>} : memref<16x32xf32, #tpu.memory_space<vmem>>, vector<16x32xf32>,
    return
  }
  func.func @transform_0(%arg0: i32) -> (i32, i32) {
    %c0_i32 = arith.constant 0 : i32
    %c0_i32_0 = arith.constant 0 : i32
    %c0_i32_1 = arith.constant 0 : i32
    return %c0_i32, %c0_i32_0 : i32, i32
  }
  func.func @transform_1(%arg0: i32) -> (i32, i32) {
    %c0_i32 = arith.constant 0 : i32
    %c0_i32_0 = arith.constant 0 : i32
    %c0_i32_1 = arith.constant 0 : i32
    return %c0_i32, %c0_i32_0 : i32, i32
  }
  func.func @transform_2(%arg0: i32) -> (i32, i32) {
    %c0_i32 = arith.constant 0 : i32
    %c0_i32_0 = arith.constant 0 : i32
    %c0_i32_1 = arith.constant 0 : i32
    return %c0_i32, %c0_i32_0 : i32, i32
  }
  func.func @transform_3(%arg0: i32) -> (i32, i32) {
    %c0_i32 = arith.constant 0 : i32
    %c0_i32_0 = arith.constant 0 : i32
    %c0_i32_1 = arith.constant 0 : i32
    return %c0_i32, %c0_i32_0 : i32, i32
  }
}

module attributes {stable_mosaic.version = 11 : i64} {
  func.func @_pooler_head_kernel(%arg0: i32, %arg1: memref<2x32xf32, #tpu.memory_space<vmem>>, %arg2: memref<32x32xf32, #tpu.memory_space<vmem>>, %arg3: memref<1x32xf32, #tpu.memory_space<vmem>>, %arg4: memref<32x128xf32, #tpu.memory_space<vmem>>, %arg5: memref<1x128xf32, #tpu.memory_space<vmem>>, %arg6: memref<2x128xf32, #tpu.memory_space<vmem>>) attributes {dimension_semantics = [#tpu.dimension_semantics<arbitrary>], iteration_bounds = array<i64: 1>, scalar_prefetch = 0 : i64, scratch_operands = 0 : i64, tpu.core_type = #tpu.core_type<tc>, window_params = [{pipeline_mode = #tpu.pipeline_mode<synchronous>, transform_indices = @transform_0, window_bounds = array<i64: 2, 32>}, {pipeline_mode = #tpu.pipeline_mode<synchronous>, transform_indices = @transform_1, window_bounds = array<i64: 32, 32>}, {pipeline_mode = #tpu.pipeline_mode<synchronous>, transform_indices = @transform_2, window_bounds = array<i64: 1, 32>}, {pipeline_mode = #tpu.pipeline_mode<synchronous>, transform_indices = @transform_3, window_bounds = array<i64: 32, 128>}, {pipeline_mode = #tpu.pipeline_mode<synchronous>, transform_indices = @transform_4, window_bounds = array<i64: 1, 128>}, {pipeline_mode = #tpu.pipeline_mode<synchronous>, transform_indices = @transform_5, window_bounds = array<i64: 2, 128>}]} {
    %c0 = arith.constant 0 : index
    %c0_0 = arith.constant 0 : index
    %0 = vector.load %arg1[%c0, %c0_0] : memref<2x32xf32, #tpu.memory_space<vmem>>, vector<2x32xf32>
    %c0_1 = arith.constant 0 : index
    %c0_2 = arith.constant 0 : index
    %1 = vector.load %arg2[%c0_1, %c0_2] : memref<32x32xf32, #tpu.memory_space<vmem>>, vector<32x32xf32>
    %cst = arith.constant dense<0.000000e+00> : vector<2x32xf32>
    %2 = tpu.matmul %0, %1, %cst {dimension_numbers = #tpu.dot_dimension_numbers<[1], [0], [0], [1], [0, 0, 1, 1], [], []>} : vector<2x32xf32>, vector<32x32xf32>, vector<2x32xf32> -> vector<2x32xf32>
    %c0_3 = arith.constant 0 : index
    %c0_4 = arith.constant 0 : index
    %3 = vector.load %arg3[%c0_3, %c0_4] : memref<1x32xf32, #tpu.memory_space<vmem>>, vector<1x32xf32>
    %4 = vector.broadcast %3 : vector<1x32xf32> to vector<2x32xf32>
    %5 = arith.addf %2, %4 : vector<2x32xf32>
    %6 = math.tanh %5 : vector<2x32xf32>
    %c0_5 = arith.constant 0 : index
    %c0_6 = arith.constant 0 : index
    %7 = vector.load %arg4[%c0_5, %c0_6] : memref<32x128xf32, #tpu.memory_space<vmem>>, vector<32x128xf32>
    %cst_7 = arith.constant dense<0.000000e+00> : vector<2x128xf32>
    %8 = tpu.matmul %6, %7, %cst_7 {dimension_numbers = #tpu.dot_dimension_numbers<[1], [0], [0], [1], [0, 0, 1, 1], [], []>} : vector<2x32xf32>, vector<32x128xf32>, vector<2x128xf32> -> vector<2x128xf32>
    %c0_8 = arith.constant 0 : index
    %c0_9 = arith.constant 0 : index
    %9 = vector.load %arg5[%c0_8, %c0_9] : memref<1x128xf32, #tpu.memory_space<vmem>>, vector<1x128xf32>
    %10 = vector.broadcast %9 : vector<1x128xf32> to vector<2x128xf32>
    %11 = arith.addf %8, %10 : vector<2x128xf32>
    %c0_10 = arith.constant 0 : index
    %c0_11 = arith.constant 0 : index
    %12 = vector.load %arg6[%c0_10, %c0_11] : memref<2x128xf32, #tpu.memory_space<vmem>>, vector<2x128xf32>
    tpu.vector_store %arg6[%c0_10, %c0_11], %11 {strides = array<i32>} : memref<2x128xf32, #tpu.memory_space<vmem>>, vector<2x128xf32>,
    return
  }
  func.func @transform_0(%arg0: i32) -> (i32, i32) {
    %c0_i32 = arith.constant 0 : i32
    %c0_i32_0 = arith.constant 0 : i32
    %c0_i32_1 = arith.constant 0 : i32
    return %c0_i32, %c0_i32_0 : i32, i32
  }
  func.func @transform_1(%arg0: i32) -> (i32, i32) {
    %c0_i32 = arith.constant 0 : i32
    %c0_i32_0 = arith.constant 0 : i32
    %c0_i32_1 = arith.constant 0 : i32
    return %c0_i32, %c0_i32_0 : i32, i32
  }
  func.func @transform_2(%arg0: i32) -> (i32, i32) {
    %c0_i32 = arith.constant 0 : i32
    %c0_i32_0 = arith.constant 0 : i32
    %c0_i32_1 = arith.constant 0 : i32
    return %c0_i32, %c0_i32_0 : i32, i32
  }
  func.func @transform_3(%arg0: i32) -> (i32, i32) {
    %c0_i32 = arith.constant 0 : i32
    %c0_i32_0 = arith.constant 0 : i32
    %c0_i32_1 = arith.constant 0 : i32
    return %c0_i32, %c0_i32_0 : i32, i32
  }
  func.func @transform_4(%arg0: i32) -> (i32, i32) {
    %c0_i32 = arith.constant 0 : i32
    %c0_i32_0 = arith.constant 0 : i32
    %c0_i32_1 = arith.constant 0 : i32
    return %c0_i32, %c0_i32_0 : i32, i32
  }
  func.func @transform_5(%arg0: i32) -> (i32, i32) {
    %c0_i32 = arith.constant 0 : i32
    %c0_i32_0 = arith.constant 0 : i32
    %c0_i32_1 = arith.constant 0 : i32
    return %c0_i32, %c0_i32_0 : i32, i32
  }
}

module attributes {stable_mosaic.version = 11 : i64} {
  func.func @_encoder_layer_kernel(%arg0: i32, %arg1: memref<8x32xf32, #tpu.memory_space<vmem>>, %arg2: memref<1x1x8xf32, #tpu.memory_space<vmem>>, %arg3: memref<32x96xf32, #tpu.memory_space<vmem>>, %arg4: memref<1x96xf32, #tpu.memory_space<vmem>>, %arg5: memref<32x32xf32, #tpu.memory_space<vmem>>, %arg6: memref<1x32xf32, #tpu.memory_space<vmem>>, %arg7: memref<32x64xf32, #tpu.memory_space<vmem>>, %arg8: memref<1x64xf32, #tpu.memory_space<vmem>>, %arg9: memref<64x32xf32, #tpu.memory_space<vmem>>, %arg10: memref<1x32xf32, #tpu.memory_space<vmem>>, %arg11: memref<4x32xf32, #tpu.memory_space<vmem>>, %arg12: memref<8x32xf32, #tpu.memory_space<vmem>>) attributes {dimension_semantics = [#tpu.dimension_semantics<parallel>], iteration_bounds = array<i64: 2>, scalar_prefetch = 0 : i64, scratch_operands = 0 : i64, tpu.core_type = #tpu.core_type<tc>, window_params = [{transform_indices = @transform_0, window_bounds = array<i64: 8, 32>}, {transform_indices = @transform_1, window_bounds = array<i64: 1, 1, 8>}, {pipeline_mode = #tpu.pipeline_mode<synchronous>, transform_indices = @transform_2, window_bounds = array<i64: 32, 96>}, {pipeline_mode = #tpu.pipeline_mode<synchronous>, transform_indices = @transform_3, window_bounds = array<i64: 1, 96>}, {pipeline_mode = #tpu.pipeline_mode<synchronous>, transform_indices = @transform_4, window_bounds = array<i64: 32, 32>}, {pipeline_mode = #tpu.pipeline_mode<synchronous>, transform_indices = @transform_5, window_bounds = array<i64: 1, 32>}, {pipeline_mode = #tpu.pipeline_mode<synchronous>, transform_indices = @transform_6, window_bounds = array<i64: 32, 64>}, {pipeline_mode = #tpu.pipeline_mode<synchronous>, transform_indices = @transform_7, window_bounds = array<i64: 1, 64>}, {pipeline_mode = #tpu.pipeline_mode<synchronous>, transform_indices = @transform_8, window_bounds = array<i64: 64, 32>}, {pipeline_mode = #tpu.pipeline_mode<synchronous>, transform_indices = @transform_9, window_bounds = array<i64: 1, 32>}, {pipeline_mode = #tpu.pipeline_mode<synchronous>, transform_indices = @transform_10, window_bounds = array<i64: 4, 32>}, {transform_indices = @transform_11, window_bounds = array<i64: 8, 32>}]} {
    %c0 = arith.constant 0 : index
    %c0_0 = arith.constant 0 : index
    %0 = vector.load %arg1[%c0, %c0_0] : memref<8x32xf32, #tpu.memory_space<vmem>>, vector<8x32xf32>
    %c0_1 = arith.constant 0 : index
    %c0_2 = arith.constant 0 : index
    %1 = vector.load %arg3[%c0_1, %c0_2] : memref<32x96xf32, #tpu.memory_space<vmem>>, vector<32x96xf32>
    %cst = arith.constant dense<0.000000e+00> : vector<8x96xf32>
    %2 = tpu.matmul %0, %1, %cst {dimension_numbers = #tpu.dot_dimension_numbers<[1], [0], [0], [1], [0, 0, 1, 1], [], []>} : vector<8x32xf32>, vector<32x96xf32>, vector<8x96xf32> -> vector<8x96xf32>
    %c0_3 = arith.constant 0 : index
    %c0_4 = arith.constant 0 : index
    %3 = vector.load %arg4[%c0_3, %c0_4] : memref<1x96xf32, #tpu.memory_space<vmem>>, vector<1x96xf32>
    %4 = vector.broadcast %3 : vector<1x96xf32> to vector<8x96xf32>
    %5 = arith.addf %2, %4 : vector<8x96xf32>
    %c0_5 = arith.constant 0 : index
    %c0_6 = arith.constant 0 : index
    %c0_7 = arith.constant 0 : index
    %6 = vector.load %arg2[%c0_5, %c0_6, %c0_7] : memref<1x1x8xf32, #tpu.memory_space<vmem>>, vector<1x1x8xf32>
    %7 = vector.shape_cast %6 : vector<1x1x8xf32> to vector<1x8xf32>
    %c0_8 = arith.constant 0 : index
    %c0_9 = arith.constant 0 : index
    %8 = vector.load %arg6[%c0_8, %c0_9] : memref<1x32xf32, #tpu.memory_space<vmem>>, vector<1x32xf32>
    %9 = vector.broadcast %8 : vector<1x32xf32> to vector<8x32xf32>
    %10 = arith.addf %0, %9 : vector<8x32xf32>
    %11 = vector.extract_strided_slice %5 {offsets = [0, 0], sizes = [8, 8], strides = [1, 1]} : vector<8x96xf32> to vector<8x8xf32>
    %12 = vector.extract_strided_slice %5 {offsets = [0, 32], sizes = [8, 8], strides = [1, 1]} : vector<8x96xf32> to vector<8x8xf32>
    %13 = vector.extract_strided_slice %5 {offsets = [0, 64], sizes = [8, 8], strides = [1, 1]} : vector<8x96xf32> to vector<8x8xf32>
    %14 = tpu.transpose %12, [1, 0] : vector<8x8xf32> -> vector<8x8xf32>
    %cst_10 = arith.constant dense<0.000000e+00> : vector<8x8xf32>
    %15 = tpu.matmul %11, %14, %cst_10 {dimension_numbers = #tpu.dot_dimension_numbers<[1], [0], [0], [1], [0, 0, 1, 1], [], []>} : vector<8x8xf32>, vector<8x8xf32>, vector<8x8xf32> -> vector<8x8xf32>
    %cst_11 = arith.constant 0.353553385 : f32
    %16 = vector.broadcast %cst_11 : f32 to vector<8x8xf32>
    %17 = arith.mulf %15, %16 : vector<8x8xf32>
    %18 = vector.broadcast %7 : vector<1x8xf32> to vector<8x8xf32>
    %19 = arith.addf %17, %18 : vector<8x8xf32>
    %cst_12 = arith.constant dense<0xFF800000> : vector<8xf32>
    %20 = vector.multi_reduction <maximumf>, %19, %cst_12 [1] : vector<8x8xf32> to vector<8xf32>
    %21 = vector.shape_cast %20 : vector<8xf32> to vector<8x1xf32>
    %22 = vector.broadcast %21 : vector<8x1xf32> to vector<8x8xf32>
    %23 = arith.subf %19, %22 : vector<8x8xf32>
    %24 = math.exp %23 : vector<8x8xf32>
    %cst_13 = arith.constant dense<0.000000e+00> : vector<8xf32>
    %25 = vector.multi_reduction <add>, %24, %cst_13 [1] : vector<8x8xf32> to vector<8xf32>
    %26 = vector.shape_cast %25 : vector<8xf32> to vector<8x1xf32>
    %27 = tpu.reciprocal %26 {approx = true} : vector<8x1xf32> -> vector<8x1xf32>
    %28 = vector.broadcast %27 : vector<8x1xf32> to vector<8x8xf32>
    %29 = arith.mulf %24, %28 : vector<8x8xf32>
    %cst_14 = arith.constant dense<0.000000e+00> : vector<8x8xf32>
    %30 = tpu.matmul %29, %13, %cst_14 {dimension_numbers = #tpu.dot_dimension_numbers<[1], [0], [0], [1], [0, 0, 1, 1], [], []>} : vector<8x8xf32>, vector<8x8xf32>, vector<8x8xf32> -> vector<8x8xf32>
    %c0_15 = arith.constant 0 : index
    %c0_16 = arith.constant 0 : index
    %31 = vector.load %arg5[%c0_15, %c0_16] : memref<32x32xf32, #tpu.memory_space<vmem>>, vector<8x32xf32>
    %cst_17 = arith.constant dense<0.000000e+00> : vector<8x32xf32>
    %32 = tpu.matmul %30, %31, %cst_17 {dimension_numbers = #tpu.dot_dimension_numbers<[1], [0], [0], [1], [0, 0, 1, 1], [], []>} : vector<8x8xf32>, vector<8x32xf32>, vector<8x32xf32> -> vector<8x32xf32>
    %33 = arith.addf %10, %32 : vector<8x32xf32>
    %34 = vector.extract_strided_slice %5 {offsets = [0, 8], sizes = [8, 8], strides = [1, 1]} : vector<8x96xf32> to vector<8x8xf32>
    %35 = vector.extract_strided_slice %5 {offsets = [0, 40], sizes = [8, 8], strides = [1, 1]} : vector<8x96xf32> to vector<8x8xf32>
    %36 = vector.extract_strided_slice %5 {offsets = [0, 72], sizes = [8, 8], strides = [1, 1]} : vector<8x96xf32> to vector<8x8xf32>
    %37 = tpu.transpose %35, [1, 0] : vector<8x8xf32> -> vector<8x8xf32>
    %cst_18 = arith.constant dense<0.000000e+00> : vector<8x8xf32>
    %38 = tpu.matmul %34, %37, %cst_18 {dimension_numbers = #tpu.dot_dimension_numbers<[1], [0], [0], [1], [0, 0, 1, 1], [], []>} : vector<8x8xf32>, vector<8x8xf32>, vector<8x8xf32> -> vector<8x8xf32>
    %cst_19 = arith.constant 0.353553385 : f32
    %39 = vector.broadcast %cst_19 : f32 to vector<8x8xf32>
    %40 = arith.mulf %38, %39 : vector<8x8xf32>
    %41 = vector.broadcast %7 : vector<1x8xf32> to vector<8x8xf32>
    %42 = arith.addf %40, %41 : vector<8x8xf32>
    %cst_20 = arith.constant dense<0xFF800000> : vector<8xf32>
    %43 = vector.multi_reduction <maximumf>, %42, %cst_20 [1] : vector<8x8xf32> to vector<8xf32>
    %44 = vector.shape_cast %43 : vector<8xf32> to vector<8x1xf32>
    %45 = vector.broadcast %44 : vector<8x1xf32> to vector<8x8xf32>
    %46 = arith.subf %42, %45 : vector<8x8xf32>
    %47 = math.exp %46 : vector<8x8xf32>
    %cst_21 = arith.constant dense<0.000000e+00> : vector<8xf32>
    %48 = vector.multi_reduction <add>, %47, %cst_21 [1] : vector<8x8xf32> to vector<8xf32>
    %49 = vector.shape_cast %48 : vector<8xf32> to vector<8x1xf32>
    %50 = tpu.reciprocal %49 {approx = true} : vector<8x1xf32> -> vector<8x1xf32>
    %51 = vector.broadcast %50 : vector<8x1xf32> to vector<8x8xf32>
    %52 = arith.mulf %47, %51 : vector<8x8xf32>
    %cst_22 = arith.constant dense<0.000000e+00> : vector<8x8xf32>
    %53 = tpu.matmul %52, %36, %cst_22 {dimension_numbers = #tpu.dot_dimension_numbers<[1], [0], [0], [1], [0, 0, 1, 1], [], []>} : vector<8x8xf32>, vector<8x8xf32>, vector<8x8xf32> -> vector<8x8xf32>
    %c8 = arith.constant 8 : index
    %c0_23 = arith.constant 0 : index
    %54 = vector.load %arg5[%c8, %c0_23] : memref<32x32xf32, #tpu.memory_space<vmem>>, vector<8x32xf32>
    %cst_24 = arith.constant dense<0.000000e+00> : vector<8x32xf32>
    %55 = tpu.matmul %53, %54, %cst_24 {dimension_numbers = #tpu.dot_dimension_numbers<[1], [0], [0], [1], [0, 0, 1, 1], [], []>} : vector<8x8xf32>, vector<8x32xf32>, vector<8x32xf32> -> vector<8x32xf32>
    %56 = arith.addf %33, %55 : vector<8x32xf32>
    %57 = vector.extract_strided_slice %5 {offsets = [0, 16], sizes = [8, 8], strides = [1, 1]} : vector<8x96xf32> to vector<8x8xf32>
    %58 = vector.extract_strided_slice %5 {offsets = [0, 48], sizes = [8, 8], strides = [1, 1]} : vector<8x96xf32> to vector<8x8xf32>
    %59 = vector.extract_strided_slice %5 {offsets = [0, 80], sizes = [8, 8], strides = [1, 1]} : vector<8x96xf32> to vector<8x8xf32>
    %60 = tpu.transpose %58, [1, 0] : vector<8x8xf32> -> vector<8x8xf32>
    %cst_25 = arith.constant dense<0.000000e+00> : vector<8x8xf32>
    %61 = tpu.matmul %57, %60, %cst_25 {dimension_numbers = #tpu.dot_dimension_numbers<[1], [0], [0], [1], [0, 0, 1, 1], [], []>} : vector<8x8xf32>, vector<8x8xf32>, vector<8x8xf32> -> vector<8x8xf32>
    %cst_26 = arith.constant 0.353553385 : f32
    %62 = vector.broadcast %cst_26 : f32 to vector<8x8xf32>
    %63 = arith.mulf %61, %62 : vector<8x8xf32>
    %64 = vector.broadcast %7 : vector<1x8xf32> to vector<8x8xf32>
    %65 = arith.addf %63, %64 : vector<8x8xf32>
    %cst_27 = arith.constant dense<0xFF800000> : vector<8xf32>
    %66 = vector.multi_reduction <maximumf>, %65, %cst_27 [1] : vector<8x8xf32> to vector<8xf32>
    %67 = vector.shape_cast %66 : vector<8xf32> to vector<8x1xf32>
    %68 = vector.broadcast %67 : vector<8x1xf32> to vector<8x8xf32>
    %69 = arith.subf %65, %68 : vector<8x8xf32>
    %70 = math.exp %69 : vector<8x8xf32>
    %cst_28 = arith.constant dense<0.000000e+00> : vector<8xf32>
    %71 = vector.multi_reduction <add>, %70, %cst_28 [1] : vector<8x8xf32> to vector<8xf32>
    %72 = vector.shape_cast %71 : vector<8xf32> to vector<8x1xf32>
    %73 = tpu.reciprocal %72 {approx = true} : vector<8x1xf32> -> vector<8x1xf32>
    %74 = vector.broadcast %73 : vector<8x1xf32> to vector<8x8xf32>
    %75 = arith.mulf %70, %74 : vector<8x8xf32>
    %cst_29 = arith.constant dense<0.000000e+00> : vector<8x8xf32>
    %76 = tpu.matmul %75, %59, %cst_29 {dimension_numbers = #tpu.dot_dimension_numbers<[1], [0], [0], [1], [0, 0, 1, 1], [], []>} : vector<8x8xf32>, vector<8x8xf32>, vector<8x8xf32> -> vector<8x8xf32>
    %c16 = arith.constant 16 : index
    %c0_30 = arith.constant 0 : index
    %77 = vector.load %arg5[%c16, %c0_30] : memref<32x32xf32, #tpu.memory_space<vmem>>, vector<8x32xf32>
    %cst_31 = arith.constant dense<0.000000e+00> : vector<8x32xf32>
    %78 = tpu.matmul %76, %77, %cst_31 {dimension_numbers = #tpu.dot_dimension_numbers<[1], [0], [0], [1], [0, 0, 1, 1], [], []>} : vector<8x8xf32>, vector<8x32xf32>, vector<8x32xf32> -> vector<8x32xf32>
    %79 = arith.addf %56, %78 : vector<8x32xf32>
    %80 = vector.extract_strided_slice %5 {offsets = [0, 24], sizes = [8, 8], strides = [1, 1]} : vector<8x96xf32> to vector<8x8xf32>
    %81 = vector.extract_strided_slice %5 {offsets = [0, 56], sizes = [8, 8], strides = [1, 1]} : vector<8x96xf32> to vector<8x8xf32>
    %82 = vector.extract_strided_slice %5 {offsets = [0, 88], sizes = [8, 8], strides = [1, 1]} : vector<8x96xf32> to vector<8x8xf32>
    %83 = tpu.transpose %81, [1, 0] : vector<8x8xf32> -> vector<8x8xf32>
    %cst_32 = arith.constant dense<0.000000e+00> : vector<8x8xf32>
    %84 = tpu.matmul %80, %83, %cst_32 {dimension_numbers = #tpu.dot_dimension_numbers<[1], [0], [0], [1], [0, 0, 1, 1], [], []>} : vector<8x8xf32>, vector<8x8xf32>, vector<8x8xf32> -> vector<8x8xf32>
    %cst_33 = arith.constant 0.353553385 : f32
    %85 = vector.broadcast %cst_33 : f32 to vector<8x8xf32>
    %86 = arith.mulf %84, %85 : vector<8x8xf32>
    %87 = vector.broadcast %7 : vector<1x8xf32> to vector<8x8xf32>
    %88 = arith.addf %86, %87 : vector<8x8xf32>
    %cst_34 = arith.constant dense<0xFF800000> : vector<8xf32>
    %89 = vector.multi_reduction <maximumf>, %88, %cst_34 [1] : vector<8x8xf32> to vector<8xf32>
    %90 = vector.shape_cast %89 : vector<8xf32> to vector<8x1xf32>
    %91 = vector.broadcast %90 : vector<8x1xf32> to vector<8x8xf32>
    %92 = arith.subf %88, %91 : vector<8x8xf32>
    %93 = math.exp %92 : vector<8x8xf32>
    %cst_35 = arith.constant dense<0.000000e+00> : vector<8xf32>
    %94 = vector.multi_reduction <add>, %93, %cst_35 [1] : vector<8x8xf32> to vector<8xf32>
    %95 = vector.shape_cast %94 : vector<8xf32> to vector<8x1xf32>
    %96 = tpu.reciprocal %95 {approx = true} : vector<8x1xf32> -> vector<8x1xf32>
    %97 = vector.broadcast %96 : vector<8x1xf32> to vector<8x8xf32>
    %98 = arith.mulf %93, %97 : vector<8x8xf32>
    %cst_36 = arith.constant dense<0.000000e+00> : vector<8x8xf32>
    %99 = tpu.matmul %98, %82, %cst_36 {dimension_numbers = #tpu.dot_dimension_numbers<[1], [0], [0], [1], [0, 0, 1, 1], [], []>} : vector<8x8xf32>, vector<8x8xf32>, vector<8x8xf32> -> vector<8x8xf32>
    %c24 = arith.constant 24 : index
    %c0_37 = arith.constant 0 : index
    %100 = vector.load %arg5[%c24, %c0_37] : memref<32x32xf32, #tpu.memory_space<vmem>>, vector<8x32xf32>
    %cst_38 = arith.constant dense<0.000000e+00> : vector<8x32xf32>
    %101 = tpu.matmul %99, %100, %cst_38 {dimension_numbers = #tpu.dot_dimension_numbers<[1], [0], [0], [1], [0, 0, 1, 1], [], []>} : vector<8x8xf32>, vector<8x32xf32>, vector<8x32xf32> -> vector<8x32xf32>
    %102 = arith.addf %79, %101 : vector<8x32xf32>
    %c0_39 = arith.constant 0 : index
    %c0_40 = arith.constant 0 : index
    %103 = vector.load %arg11[%c0_39, %c0_40] : memref<4x32xf32, #tpu.memory_space<vmem>>, vector<1x32xf32>
    %c1 = arith.constant 1 : index
    %c0_41 = arith.constant 0 : index
    %104 = vector.load %arg11[%c1, %c0_41] : memref<4x32xf32, #tpu.memory_space<vmem>>, vector<1x32xf32>
    %cst_42 = arith.constant dense<0.000000e+00> : vector<8xf32>
    %105 = vector.multi_reduction <add>, %102, %cst_42 [1] : vector<8x32xf32> to vector<8xf32>
    %106 = vector.shape_cast %105 : vector<8xf32> to vector<8x1xf32>
    %cst_43 = arith.constant 3.200000e+01 : f32
    %107 = vector.broadcast %cst_43 : f32 to vector<8x1xf32>
    %108 = arith.divf %106, %107 : vector<8x1xf32>
    %109 = vector.broadcast %108 : vector<8x1xf32> to vector<8x32xf32>
    %110 = arith.subf %102, %109 : vector<8x32xf32>
    %111 = arith.mulf %110, %110 : vector<8x32xf32>
    %cst_44 = arith.constant dense<0.000000e+00> : vector<8xf32>
    %112 = vector.multi_reduction <add>, %111, %cst_44 [1] : vector<8x32xf32> to vector<8xf32>
    %113 = vector.shape_cast %112 : vector<8xf32> to vector<8x1xf32>
    %cst_45 = arith.constant 3.200000e+01 : f32
    %114 = vector.broadcast %cst_45 : f32 to vector<8x1xf32>
    %115 = arith.divf %113, %114 : vector<8x1xf32>
    %116 = vector.broadcast %108 : vector<8x1xf32> to vector<8x32xf32>
    %117 = arith.subf %102, %116 : vector<8x32xf32>
    %cst_46 = arith.constant 9.99999996E-13 : f32
    %118 = vector.broadcast %cst_46 : f32 to vector<8x1xf32>
    %119 = arith.addf %115, %118 : vector<8x1xf32>
    %120 = math.rsqrt %119 : vector<8x1xf32>
    %121 = vector.broadcast %120 : vector<8x1xf32> to vector<8x32xf32>
    %122 = arith.mulf %117, %121 : vector<8x32xf32>
    %123 = vector.broadcast %103 : vector<1x32xf32> to vector<8x32xf32>
    %124 = arith.mulf %122, %123 : vector<8x32xf32>
    %125 = vector.broadcast %104 : vector<1x32xf32> to vector<8x32xf32>
    %126 = arith.addf %124, %125 : vector<8x32xf32>
    %c0_47 = arith.constant 0 : index
    %c0_48 = arith.constant 0 : index
    %127 = vector.load %arg7[%c0_47, %c0_48] : memref<32x64xf32, #tpu.memory_space<vmem>>, vector<32x64xf32>
    %cst_49 = arith.constant dense<0.000000e+00> : vector<8x64xf32>
    %128 = tpu.matmul %126, %127, %cst_49 {dimension_numbers = #tpu.dot_dimension_numbers<[1], [0], [0], [1], [0, 0, 1, 1], [], []>} : vector<8x32xf32>, vector<32x64xf32>, vector<8x64xf32> -> vector<8x64xf32>
    %c0_50 = arith.constant 0 : index
    %c0_51 = arith.constant 0 : index
    %129 = vector.load %arg8[%c0_50, %c0_51] : memref<1x64xf32, #tpu.memory_space<vmem>>, vector<1x64xf32>
    %130 = vector.broadcast %129 : vector<1x64xf32> to vector<8x64xf32>
    %131 = arith.addf %128, %130 : vector<8x64xf32>
    %cst_52 = arith.constant 5.000000e-01 : f32
    %132 = vector.broadcast %cst_52 : f32 to vector<8x64xf32>
    %133 = arith.mulf %132, %131 : vector<8x64xf32>
    %cst_53 = arith.constant 4.471500e-02 : f32
    %134 = vector.broadcast %cst_53 : f32 to vector<8x64xf32>
    %135 = arith.mulf %134, %131 : vector<8x64xf32>
    %136 = arith.mulf %135, %131 : vector<8x64xf32>
    %137 = arith.mulf %136, %131 : vector<8x64xf32>
    %138 = arith.addf %131, %137 : vector<8x64xf32>
    %cst_54 = arith.constant 0.797884583 : f32
    %139 = vector.broadcast %cst_54 : f32 to vector<8x64xf32>
    %140 = arith.mulf %139, %138 : vector<8x64xf32>
    %141 = math.tanh %140 : vector<8x64xf32>
    %cst_55 = arith.constant 1.000000e+00 : f32
    %142 = vector.broadcast %cst_55 : f32 to vector<8x64xf32>
    %143 = arith.addf %142, %141 : vector<8x64xf32>
    %144 = arith.mulf %133, %143 : vector<8x64xf32>
    %c0_56 = arith.constant 0 : index
    %c0_57 = arith.constant 0 : index
    %145 = vector.load %arg9[%c0_56, %c0_57] : memref<64x32xf32, #tpu.memory_space<vmem>>, vector<64x32xf32>
    %cst_58 = arith.constant dense<0.000000e+00> : vector<8x32xf32>
    %146 = tpu.matmul %144, %145, %cst_58 {dimension_numbers = #tpu.dot_dimension_numbers<[1], [0], [0], [1], [0, 0, 1, 1], [], []>} : vector<8x64xf32>, vector<64x32xf32>, vector<8x32xf32> -> vector<8x32xf32>
    %c0_59 = arith.constant 0 : index
    %c0_60 = arith.constant 0 : index
    %147 = vector.load %arg10[%c0_59, %c0_60] : memref<1x32xf32, #tpu.memory_space<vmem>>, vector<1x32xf32>
    %148 = vector.broadcast %147 : vector<1x32xf32> to vector<8x32xf32>
    %149 = arith.addf %146, %148 : vector<8x32xf32>
    %150 = arith.addf %149, %126 : vector<8x32xf32>
    %c2 = arith.constant 2 : index
    %c0_61 = arith.constant 0 : index
    %151 = vector.load %arg11[%c2, %c0_61] : memref<4x32xf32, #tpu.memory_space<vmem>>, vector<1x32xf32>
    %c3 = arith.constant 3 : index
    %c0_62 = arith.constant 0 : index
    %152 = vector.load %arg11[%c3, %c0_62] : memref<4x32xf32, #tpu.memory_space<vmem>>, vector<1x32xf32>
    %cst_63 = arith.constant dense<0.000000e+00> : vector<8xf32>
    %153 = vector.multi_reduction <add>, %150, %cst_63 [1] : vector<8x32xf32> to vector<8xf32>
    %154 = vector.shape_cast %153 : vector<8xf32> to vector<8x1xf32>
    %cst_64 = arith.constant 3.200000e+01 : f32
    %155 = vector.broadcast %cst_64 : f32 to vector<8x1xf32>
    %156 = arith.divf %154, %155 : vector<8x1xf32>
    %157 = vector.broadcast %156 : vector<8x1xf32> to vector<8x32xf32>
    %158 = arith.subf %150, %157 : vector<8x32xf32>
    %159 = arith.mulf %158, %158 : vector<8x32xf32>
    %cst_65 = arith.constant dense<0.000000e+00> : vector<8xf32>
    %160 = vector.multi_reduction <add>, %159, %cst_65 [1] : vector<8x32xf32> to vector<8xf32>
    %161 = vector.shape_cast %160 : vector<8xf32> to vector<8x1xf32>
    %cst_66 = arith.constant 3.200000e+01 : f32
    %162 = vector.broadcast %cst_66 : f32 to vector<8x1xf32>
    %163 = arith.divf %161, %162 : vector<8x1xf32>
    %164 = vector.broadcast %156 : vector<8x1xf32> to vector<8x32xf32>
    %165 = arith.subf %150, %164 : vector<8x32xf32>
    %cst_67 = arith.constant 9.99999996E-13 : f32
    %166 = vector.broadcast %cst_67 : f32 to vector<8x1xf32>
    %167 = arith.addf %163, %166 : vector<8x1xf32>
    %168 = math.rsqrt %167 : vector<8x1xf32>
    %169 = vector.broadcast %168 : vector<8x1xf32> to vector<8x32xf32>
    %170 = arith.mulf %165, %169 : vector<8x32xf32>
    %171 = vector.broadcast %151 : vector<1x32xf32> to vector<8x32xf32>
    %172 = arith.mulf %170, %171 : vector<8x32xf32>
    %173 = vector.broadcast %152 : vector<1x32xf32> to vector<8x32xf32>
    %174 = arith.addf %172, %173 : vector<8x32xf32>
    %c0_68 = arith.constant 0 : index
    %c0_69 = arith.constant 0 : index
    %175 = vector.load %arg12[%c0_68, %c0_69] : memref<8x32xf32, #tpu.memory_space<vmem>>, vector<8x32xf32>
    tpu.vector_store %arg12[%c0_68, %c0_69], %174 {strides = array<i32>} : memref<8x32xf32, #tpu.memory_space<vmem>>, vector<8x32xf32>,
    return
  }
  func.func @transform_0(%arg0: i32) -> (i32, i32) {
    %c0_i32 = arith.constant 0 : i32
    %c0_i32_0 = arith.constant 0 : i32
    return %arg0, %c0_i32 : i32, i32
  }
  func.func @transform_1(%arg0: i32) -> (i32, i32, i32) {
    %c0_i32 = arith.constant 0 : i32
    %c0_i32_0 = arith.constant 0 : i32
    %c0_i32_1 = arith.constant 0 : i32
    return %arg0, %c0_i32, %c0_i32_0 : i32, i32, i32
  }
  func.func @transform_2(%arg0: i32) -> (i32, i32) {
    %c0_i32 = arith.constant 0 : i32
    %c0_i32_0 = arith.constant 0 : i32
    %c0_i32_1 = arith.constant 0 : i32
    return %c0_i32, %c0_i32_0 : i32, i32
  }
  func.func @transform_3(%arg0: i32) -> (i32, i32) {
    %c0_i32 = arith.constant 0 : i32
    %c0_i32_0 = arith.constant 0 : i32
    %c0_i32_1 = arith.constant 0 : i32
    return %c0_i32, %c0_i32_0 : i32, i32
  }
  func.func @transform_4(%arg0: i32) -> (i32, i32) {
    %c0_i32 = arith.constant 0 : i32
    %c0_i32_0 = arith.constant 0 : i32
    %c0_i32_1 = arith.constant 0 : i32
    return %c0_i32, %c0_i32_0 : i32, i32
  }
  func.func @transform_5(%arg0: i32) -> (i32, i32) {
    %c0_i32 = arith.constant 0 : i32
    %c0_i32_0 = arith.constant 0 : i32
    %c0_i32_1 = arith.constant 0 : i32
    return %c0_i32, %c0_i32_0 : i32, i32
  }
  func.func @transform_6(%arg0: i32) -> (i32, i32) {
    %c0_i32 = arith.constant 0 : i32
    %c0_i32_0 = arith.constant 0 : i32
    %c0_i32_1 = arith.constant 0 : i32
    return %c0_i32, %c0_i32_0 : i32, i32
  }
  func.func @transform_7(%arg0: i32) -> (i32, i32) {
    %c0_i32 = arith.constant 0 : i32
    %c0_i32_0 = arith.constant 0 : i32
    %c0_i32_1 = arith.constant 0 : i32
    return %c0_i32, %c0_i32_0 : i32, i32
  }
  func.func @transform_8(%arg0: i32) -> (i32, i32) {
    %c0_i32 = arith.constant 0 : i32
    %c0_i32_0 = arith.constant 0 : i32
    %c0_i32_1 = arith.constant 0 : i32
    return %c0_i32, %c0_i32_0 : i32, i32
  }
  func.func @transform_9(%arg0: i32) -> (i32, i32) {
    %c0_i32 = arith.constant 0 : i32
    %c0_i32_0 = arith.constant 0 : i32
    %c0_i32_1 = arith.constant 0 : i32
    return %c0_i32, %c0_i32_0 : i32, i32
  }
  func.func @transform_10(%arg0: i32) -> (i32, i32) {
    %c0_i32 = arith.constant 0 : i32
    %c0_i32_0 = arith.constant 0 : i32
    %c0_i32_1 = arith.constant 0 : i32
    return %c0_i32, %c0_i32_0 : i32, i32
  }
  func.func @transform_11(%arg0: i32) -> (i32, i32) {
    %c0_i32 = arith.constant 0 : i32
    %c0_i32_0 = arith.constant 0 : i32
    return %arg0, %c0_i32 : i32, i32
  }
}

</mosaic_0001>

<bundles_post_ra>
// kernel: sentiment_classifier_forward.4
= control target key start
LH: loop header
LB: loop body
LE: loop exit
PB: predicated region body
PF: predicated region fallthrough
CT: control target
= control target key end

     0   :  { %vm18_vm0 = vcmask 261120   ;;  %s118_s0 = inlined_call_operand.vmem [shape: f32[16,32], index: 0, kind: input, shape index: {}]   ;;  %s119_s1 = inlined_call_operand.vmem [shape: f32[1,32], index: 1, kind: input, shape index: {}]   ;;  %s120_s2 = inlined_call_operand.vmem [shape: f32[1,32], index: 2, kind: input, shape index: {}]   ;;  %s121_s3 = inlined_call_operand.vmem [shape: f32[16,32], index: 3, kind: output, shape index: {}]  }
   0x1   :  { %v14_v0 = vld [vmem:[%s118_s0] sm:$0xff]  ;;  %v15_v1 = vld [vmem:[%s118_s0 + $0x8] sm:$0xff] }
   0x2   :  { %v19_v2 = vsel %vm18_vm0, %v14_v0, 0.0  ;;  %v22_v3 = vsel %vm18_vm0, %v15_v1, 0.0  ;;  %v68_v21 = vld [vmem:[%s119_s1] ss:$0 sm:$0xff] }
   0x3   :  { %20 = vadd.xlane.f32.xlu0 %v19_v2  ;;  %v69_v23 = vld [vmem:[%s120_s2] ss:$0 sm:$0xff] }
   0x7   :  { %23 = vadd.xlane.f32.xlu0 %v22_v3 }
  0x8c   :  { %v21_v4 = vpop.xlane.xlu0 %20 }
  0x8d   :  { %v26_v5 = vmul.f32 0.03125, %v21_v4 }
  0x8f   :  { %v28_v6 = vsub.f32 %v14_v0, %v26_v5 }
  0x90   :  { %v24_v7 = vpop.xlane.xlu0 %23 }
  0x91   :  { %v27_v8 = vmul.f32 0.03125, %v24_v7  ;;  %v30_v9 = vmul.f32 %v28_v6, %v28_v6 }
  0x93   :  { %v29_v10 = vsub.f32 %v15_v1, %v27_v8  ;;  %v32_v11 = vsel %vm18_vm0, %v30_v9, 0.0 }
  0x94   :  { %33 = vadd.xlane.f32.xlu1 %v32_v11 }
  0x95   :  { %v31_v12 = vmul.f32 %v29_v10, %v29_v10 }
  0x97   :  { %v35_v13 = vsel %vm18_vm0, %v31_v12, 0.0 }
  0x98   :  { %36 = vadd.xlane.f32.xlu1 %v35_v13 }
 0x11d   :  { %v34_v14 = vpop.xlane.xlu1 %33 }
 0x11e   :  { %v38_v15 = vmul.f32 0.03125, %v34_v14 }
 0x120   :  { %v40_v16 = vadd.f32 1e-12, %v38_v15 }
 0x121   :  { %v37_v17 = vpop.xlane.xlu1 %36 }
 0x122   :  { %70 = vrsqrt.f32 %v40_v16  ;;  %v39_v18 = vmul.f32 0.03125, %v37_v17 }
 0x124   :  { %v41_v19 = vadd.f32 1e-12, %v39_v18 }
 0x126   :  { %72 = vrsqrt.f32 %v41_v19 }
 0x12f   :  { %v71_v20 = vpop.eup %70 }
 0x130   :  { %v44_v22 = vmul.f32 %v71_v20, %v28_v6 }
 0x132   :  { %v52_v24 = vmul.f32 %v68_v21, %v44_v22 }
 0x133   :  { %v73_v25 = vpop.eup %72 }
 0x134   :  { %v60_v26 = vadd.f32 %v69_v23, %v52_v24  ;;  %v45_v27 = vmul.f32 %v73_v25, %v29_v10 }
 0x136   :  { %62 = vst.msk [vmem:[%s121_s3] sm:$0xff] %vm18_vm0, %v60_v26  ;;  %v53_v28 = vmul.f32 %v68_v21, %v45_v27 }
 0x138   :  { %v61_v29 = vadd.f32 %v69_v23, %v53_v28 }
 0x13a   :  { %63 = vst.msk [vmem:[%s121_s3 + $0x8] sm:$0xff] %vm18_vm0, %v61_v29 }

// kernel: sentiment_classifier_forward.7
= control target key start
LH: loop header
LB: loop body
LE: loop exit
PB: predicated region body
PF: predicated region fallthrough
CT: control target
= control target key end

     0   :  { %v270_v1 = vmov 0.0   ;;  %vm271_vm0 = vmmov 0   ;;  %s341_s0 = inlined_call_operand.vmem [shape: f32[2,32], index: 0, kind: input, shape index: {}]   ;;  %s342_s1 = inlined_call_operand.vmem [shape: f32[32,32], index: 1, kind: input, shape index: {}]   ;;  %s343_s2 = inlined_call_operand.vmem [shape: f32[1,32], index: 2, kind: input, shape index: {}]   ;;  %s344_s3 = inlined_call_operand.vmem [shape: f32[32,128], index: 3, kind: input, shape index: {}]   ;;  %s345_s4 = inlined_call_operand.vmem [shape: f32[1,128], index: 4, kind: input, shape index: {}]   ;;  %s346_s5 = inlined_call_operand.hbm [shape: f32[2,128], index: 5, kind: output, shape index: {}]  }
   0x1   :  { %v25_v0 = vld [vmem:[%s342_s1 + $0x18] sm:$0xff]  ;;  %221 = vmatprep.subr.mxu0 %v270_v1  ;;  %v24_v2 = vld [vmem:[%s342_s1 + $0x10] sm:$0xff]  ;;  %229 = vmatprep.mubr.msk.f32.mxu0 %vm271_vm0, %v270_v1 }
   0x2   :  { %222 = vmatpush3.msra.mxu0 %v25_v0  ;;  %232 = vmatprep.subr.mxu1 %v270_v1 }
   0x3   :  { %10 = vsyncpa [#allocation3], 0  ;;  %223 = vmatprep.subr.mxu0 %v270_v1  ;;  %v23_v3 = vld [vmem:[%s342_s1 + $0x8] sm:$0xff]  ;;  %240 = vmatprep.mubr.msk.f32.mxu1 %vm271_vm0, %v270_v1  ;;  %v22_v4 = vld [vmem:[%s342_s1] sm:$0xff]  ;;  %vm33_vm1 = vcmask 261120   ;;  %s272_s13 = smov [#allocation2]  }
   0x4   :  { %224 = vmatpush3.msra.mxu0 %v24_v2  ;;  %v21_v5 = vld [vmem:[%s341_s0] sm:$0x3]  ;;  %v111_v6 = vld [vmem:[%s344_s3 + $0x18] sm:$0xff]  ;;  %v110_v7 = vld [vmem:[%s344_s3 + $0x10] sm:$0xff] }
   0x5   :  { %225 = vmatprep.subr.mxu0 %v270_v1  ;;  %233 = vmatpush3.msra.mxu1 %v111_v6  ;;  %v109_v8 = vld [vmem:[%s344_s3 + $0x8] sm:$0xff]  ;;  %v108_v9 = vld [vmem:[%s344_s3] sm:$0xff]  ;;  %s199_s3 = sshll.u32 %s272_s13, 4  ;;  %s200_s3 = int_to_ptr.vmem [resolvable:$true] %s199_s3 }
   0x6   :  { %226 = vmatpush3.msra.mxu0 %v23_v3  ;;  %234 = vmatprep.subr.mxu1 %v270_v1  ;;  %v207_v10 = vld [vmem:[%s343_s2] ss:$0 sm:$0xff]  ;;  %s248_s14 = scalar_lea.vmem %s200_s3, 32  ;;  %p253_p1 = scmp.lt.s32.totalorder %s200_s3, %s200_s3 }
   0x7   :  { %227 = vmatprep.subr.mxu0 %v270_v1  ;;  %235 = vmatpush3.msra.mxu1 %v110_v7  ;;  %v209_v15 = vld [vmem:[%s345_s4] ss:$0 sm:$0xff]  ;;  %p249_p0 = scmp.ne.s32.totalorder %s200_s3, %s248_s14  ;;  %p254_p2 = scmp.lt.s32.totalorder %s248_s14, %s248_s14 }
   0x8   :  { %228 = vmatpush3.msra.mxu0 %v22_v4  ;;  %236 = vmatprep.subr.mxu1 %v270_v1 }
   0x9   :  { %230 = vmatmul.mubr.msk.f32.vlgmr.msra.gmra.mxu0 %vm33_vm1, %v21_v5  ;;  %237 = vmatpush3.msra.mxu1 %v109_v8  ;;  %p255_p3 = por %p254_p2, %p253_p1 }
   0xa   :  { %238 = vmatprep.subr.mxu1 %v270_v1 }
   0xb   :  { %239 = vmatpush3.msra.mxu1 %v108_v9  ;;  %p256_p4 = pnand %p255_p3, %p249_p0 }
  0xc9   :  { %v103_v11 = vpop.f32.mrf.mxu0 }
  0xca   :  { %v104_v12 = vadd.f32 %v207_v10, %v103_v11 }
  0xcb   :  { %v231_v13 = vpop.f32.mrf.mxu0 }
  0xcc   :  { %246 = vtanh.f32 %v104_v12 }
  0xd9   :  { %v247_v14 = vpop.eup %246 }
  0xda   :  { %241 = vmatmul.mubr.msk.f32.vlgmr.msra.gmra.mxu1 %vm33_vm1, %v247_v14 }
 0x19a   :  { %v188_v16 = vpop.f32.mrf.mxu1 }
 0x19b   :  { %v189_v17 = vadd.f32 %v209_v15, %v188_v16 }
 0x19c   :  { %v242_v18 = vpop.f32.mrf.mxu1 }
 0x19d   :  { %192 = vst [vmem:[#allocation2] sm:$0x3] %v189_v17 }
 0x19e   :  { %259 = shalt.err (!%p256_p4)
}
 0x19f   :  { %202 = dma.vmem_to_hbm [thread:$0]  %s200_s3, 32, %s346_s5, [#allocation3]  }
 0x1a0   :  { %268 = dma.done.wait [#allocation3], 32  }
 0x1a1   :  { %269 = vsyncadd [#allocation3], 4294967264 }
 0x1a2   :  { %206 = vsyncpa [#allocation3], 1 }

// kernel: sentiment_classifier_forward.5
= control target key start
LH: loop header
LB: loop body
LE: loop exit
PB: predicated region body
PF: predicated region fallthrough
CT: control target
= control target key end

     0   :  { %s2067_s17 = smov 0   ;;  %s2292_s0 = inlined_call_operand.vmem [shape: f32[16,32], index: 0, kind: input, shape index: {}]   ;;  %s2293_s1 = inlined_call_operand.vmem [shape: f32[2,1,8], index: 1, kind: input, shape index: {}]   ;;  %s2294_s2 = inlined_call_operand.vmem [shape: f32[32,96], index: 2, kind: input, shape index: {}]   ;;  %s2295_s3 = inlined_call_operand.vmem [shape: f32[1,96], index: 3, kind: input, shape index: {}]   ;;  %s2296_s4 = inlined_call_operand.vmem [shape: f32[32,32], index: 4, kind: input, shape index: {}]   ;;  %s2297_s5 = inlined_call_operand.vmem [shape: f32[1,32], index: 5, kind: input, shape index: {}]   ;;  %s2298_s6 = inlined_call_operand.vmem [shape: f32[32,64], index: 6, kind: input, shape index: {}]   ;;  %s2299_s7 = inlined_call_operand.vmem [shape: f32[1,64], index: 7, kind: input, shape index: {}]   ;;  %s2300_s8 = inlined_call_operand.vmem [shape: f32[64,32], index: 8, kind: input, shape index: {}]   ;;  %s2301_s9 = inlined_call_operand.vmem [shape: f32[1,32], index: 9, kind: input, shape index: {}]   ;;  %s2302_s10 = inlined_call_operand.vmem [shape: f32[4,32], index: 10, kind: input, shape index: {}]   ;;  %s2303_s11 = inlined_call_operand.vmem [shape: f32[16,32], index: 11, kind: output, shape index: {}]  }
   0x1 LB: > { %s1762_s18 = sadd.s32 4294967295, %s1992_s17   ;;  %p1766_p0 = scmp.ge.s32.totalorder %s1992_s17, 1  ;;  %s1992_s17 = sphi %s2067_s17, %s21_s17  }
   0x2   : > { %p344_p1 = scmp.lt.s32.totalorder %s1992_s17, 3 }
   0x4   : > { %p345_p2 = pnand %p1766_p0, %p344_p1 }
   0x5   : > { %p385_p3 = scmp.lt.s32.totalorder (!%p345_p2), %s1762_s18, 1  ;;  %s1996_s14 = smov (!%p345_p2), 64  }
   0x6   : > { %348 = sbr.rel (%p345_p2) target bundleno = 3806 (0xede), region = 64  ;;  %s1997_s15 = smov (!%p345_p2), 96  }
   0x7   : > { %s1998_s16 = smov (!%p345_p2), 88   ;;  %s1999_s22 = smov (!%p345_p2), 56  }
   0x8   : > { %s2000_s23 = smov (!%p345_p2), 120   ;;  %s2001_s27 = smov (!%p345_p2), 80  }
   0x9   : > { %s2002_s28 = smov (!%p345_p2), 112   ;;  %s2003_s12 = smov (!%p345_p2), 48  }
   0xa   : > { %s2004_s13 = smov (!%p345_p2), 72  }
   0xb   : > { %v400_v0 = vld [vmem:[%s2294_s2 + $0x18] sm:$0xff]  ;;  %v1994_v1 = vmov 0.0   ;;  %v399_v2 = vld [vmem:[%s2294_s2 + $0x10] sm:$0xff]  ;;  %vm1995_vm0 = vmmov 0   ;;  %s2305_s18 = smov (!%p385_p3, %s1762_s18), 1  ;;  %v398_v3 = vld [vmem:[%s2294_s2 + $0x8] sm:$0xff] }
   0xc   : > { %1842 = vmatprep.subr.mxu0 %v1994_v1  ;;  %1850 = vmatprep.mubr.msk.f32.mxu0 %vm1995_vm0, %v1994_v1  ;;  %s1767_s25 = sshll.u32 %s2305_s18, 3  ;;  %v397_v4 = vld [vmem:[%s2294_s2] sm:$0xff]  ;;  %vm408_vm1 = vcmask 261120   ;;  %vm494_vm2 = vcmask 64512   ;;  %s391_s21 = scalar_lea.vmem %s2293_s1, %s2305_s18  ;;  %v906_v49 = vld [vmem:[%s2296_s4 + $0x8] sm:$0xff]  ;;  %vm1599_vm3 = vcmask 523264  }
   0xd   : > { %1843 = vmatpush3.msra.mxu0 %v400_v0  ;;  %1858 = vmatprep.subr.mxu1 %v1994_v1  ;;  %s388_s30 = scalar_lea.vmem %s2292_s0, %s1767_s25  ;;  %v1769_v6 = vld [vmem:[%s2295_s3] ss:$0 sm:$0xff] }
   0xe   : > { %1844 = vmatprep.subr.mxu0 %v1994_v1  ;;  %1860 = vmatprep.mubr.msk.f32.mxu1 %vm1995_vm0, %v1994_v1  ;;  %v2103_v5 = vld [vmem:[%s388_s30] sm:$0xff] }
   0xf   : > { %1845 = vmatpush3.msra.mxu0 %v399_v2  ;;  %v2130_v13 = vld [vmem:[%s391_s21] ss:$0 sm:$0xff]  ;;  %s2006_s21 = smov 40  }
  0x10   : > { %1846 = vmatprep.subr.mxu0 %v1994_v1  ;;  %v664_v23 = vld [vmem:[%s2296_s4] sm:$0xff] }
  0x11   : > { %1847 = vmatpush3.msra.mxu0 %v398_v3  ;;  %v1771_v63 = vld [vmem:[%s2297_s5] ss:$0 sm:$0xff] }
  0x12   : > { %1848 = vmatprep.subr.mxu0 %v1994_v1  ;;  %v490_v0 = vadd.f32 %v1771_v63, %v2103_v5  ;;  %v1584_v63 = vld [vmem:[%s2300_s8] sm:$0xff] }
  0x13   : > { %1849 = vmatpush3.msra.mxu0 %v397_v4 }
  0x14   : > { %1851 = vmatmul.mubr.msk.f32.vlgmr.msra.gmra.mxu0 %vm408_vm1, %v2103_v5  ;;  %1853 = vmatprep.subr.mxu0 %v1994_v1  ;;  %v1148_v5 = vld [vmem:[%s2296_s4 + $0x10] sm:$0xff] }
  0x15   : > { %1855 = vmatprep.mubr.msk.f32.mxu0 %vm1995_vm0, %v1994_v1 }
  0xd4   : > { %v478_v7 = vpop.f32.mrf.mxu0 }
  0xd5   : > { %v2114_v8 = vadd.f32 %v1769_v6, %v478_v7 }
  0xd6   : > { %v1852_v9 = vpop.f32.mrf.mxu0 }
  0xd7   : > { %588 = vrot.lane.b32.xlu1 %v2114_v8, %s1996_s14  ;;  %492 = vrot.lane.b32.xlu0 %v2114_v8, %s1997_s15  ;;  %s2005_s14 = smov 104  }
  0xdb   : > { %741 = vrot.lane.b32.xlu1 %v2114_v8, %s1998_s16 }
 0x149   : > { %v589_v10 = vpop.permute.xlu1 %588  ;;  %v493_v11 = vpop.permute.xlu0 %492 }
 0x14a   : > { %1854 = vmatpush3.xpose.msk.msra.mxu0 %vm494_vm2, %v493_v11  ;;  %1859 = vmatpush3.msra.mxu1 %v589_v10 }
 0x14b   : > { %1868 = vmatprep.subr.mxu1 %v1994_v1  ;;  %1863 = vmatprep.subr.mxu0 %v1994_v1 }
 0x14d   : > { %1856 = vmatmul.mubr.msk.f32.vlgmr.msra.gmra.mxu0 %vm494_vm2, %v2114_v8  ;;  %v742_v24 = vpop.permute.xlu1 %741 }
 0x14e   : > { %1865 = vmatprep.mubr.msk.f32.mxu0 %vm1995_vm0, %v1994_v1  ;;  %1864 = vmatpush3.msra.mxu0 %v664_v23 }
 0x14f   : > { %1873 = vmatprep.subr.mxu0 %v1994_v1 }
 0x20d   : > { %v565_v12 = vpop.f32.mrf.mxu0 }
 0x20e   : > { %v569_v14 = vmul.f32 0.35355338, %v565_v12 }
 0x20f   : > { %v1857_v15 = vpop.f32.mrf.mxu0 }
 0x210   : > { %v576_v16 = vadd.f32 %v2130_v13, %v569_v14 }
 0x212   : > { %v577_v17 = vsel %vm494_vm2, %v576_v16, -inf }
 0x213   : > { %578 = vmax.xlane.f32.xlu0 %v577_v17 }
 0x229   : > { %830 = vrot.lane.b32.xlu0 %v2114_v8, %s1999_s22 }
 0x29c   : > { %v579_v18 = vpop.xlane.xlu0 %578 }
 0x29d   : > { %v580_v19 = vsub.f32 %v576_v16, %v579_v18 }
 0x29f   : > { %v581_v20 = vmul.f32 1.442695, %v580_v19 }
 0x2a0   : > { %v831_v30 = vpop.permute.xlu0 %830 }
 0x2a1   : > { %1964 = vpow2.f32 %v581_v20 }
 0x2ae   : > { %v1965_v21 = vpop.eup %1964 }
 0x2af   : > { %v583_v22 = vsel %vm494_vm2, %v1965_v21, 0.0 }
 0x2b0   : > { %584 = vadd.xlane.f32.xlu1 %v583_v22 }
 0x2c1   : > { %739 = vrot.lane.b32.xlu1 %v2114_v8, %s2000_s23 }
 0x339   : > { %v585_v25 = vpop.xlane.xlu1 %584 }
 0x33a   : > { %1966 = vrcp.f32 %v585_v25 }
 0x33d   : > { %v740_v28 = vpop.permute.xlu1 %739 }
 0x347   : > { %v1967_v26 = vpop.eup %1966 }
 0x348   : > { %v587_v27 = vmul.f32 %v1967_v26, %v1965_v21 }
 0x34a   : > { %1861 = vmatmul.mubr.msk.f32.vlgmr.msra.gmra.mxu1 %vm494_vm2, %v587_v27  ;;  %v1390_v27 = vld [vmem:[%s2296_s4 + $0x18] sm:$0xff] }
 0x34b   : > { %1869 = vmatpush3.xpose.msk.msra.mxu1 %vm494_vm2, %v742_v24  ;;  %1870 = vmatprep.mubr.msk.f32.mxu1 %vm1995_vm0, %v1994_v1 }
 0x34c   : > { %1878 = vmatprep.subr.mxu1 %v1994_v1 }
 0x34e   : > { %1871 = vmatmul.mubr.msk.f32.vlgmr.msra.gmra.mxu1 %vm494_vm2, %v740_v28 }
 0x34f   : > { %1880 = vmatprep.mubr.msk.f32.mxu1 %vm1995_vm0, %v1994_v1  ;;  %1879 = vmatpush3.msra.mxu1 %v906_v49 }
 0x350   : > { %1888 = vmatprep.subr.mxu1 %v1994_v1 }
 0x40a   : > { %v660_v29 = vpop.f32.mrf.mxu1 }
 0x40b   : > { %1866 = vmatmul.mubr.msk.f32.vlgmr.msra.gmra.mxu0 %vm494_vm2, %v660_v29 }
 0x40c   : > { %1874 = vmatpush3.msra.mxu0 %v831_v30  ;;  %v1862_v31 = vpop.f32.mrf.mxu1  ;;  %1875 = vmatprep.mubr.msk.f32.mxu0 %vm1995_vm0, %v1994_v1 }
 0x40d   : > { %1883 = vmatprep.subr.mxu0 %v1994_v1 }
 0x40e   : > { %v813_v32 = vpop.f32.mrf.mxu1 }
 0x40f   : > { %v817_v33 = vmul.f32 0.35355338, %v813_v32 }
 0x410   : > { %v1872_v34 = vpop.f32.mrf.mxu1 }
 0x411   : > { %v818_v35 = vadd.f32 %v2130_v13, %v817_v33 }
 0x413   : > { %v819_v36 = vsel %vm494_vm2, %v818_v35, -inf }
 0x414   : > { %820 = vmax.xlane.f32.xlu1 %v819_v36 }
 0x49d   : > { %v821_v37 = vpop.xlane.xlu1 %820 }
 0x49e   : > { %v822_v38 = vsub.f32 %v818_v35, %v821_v37 }
 0x4a0   : > { %v823_v39 = vmul.f32 1.442695, %v822_v38 }
 0x4a2   : > { %1968 = vpow2.f32 %v823_v39 }
 0x4af   : > { %v1969_v40 = vpop.eup %1968 }
 0x4b0   : > { %v825_v41 = vsel %vm494_vm2, %v1969_v40, 0.0 }
 0x4b1   : > { %826 = vadd.xlane.f32.xlu0 %v825_v41 }
 0x4c7   : > { %983 = vrot.lane.b32.xlu0 %v2114_v8, %s2001_s27 }
 0x4cb   : > { %981 = vrot.lane.b32.xlu0 %v2114_v8, %s2002_s28  ;;  %v734_v42 = vpop.f32.mrf.mxu0 }
 0x4cc   : > { %v738_v2 = vadd.f32 %v734_v42, %v490_v0  ;;  %v1791_v0 = vld [vmem:[%s2299_s7] ss:$0 sm:$0xff] }
 0x4cd   : > { %v1867_v43 = vpop.f32.mrf.mxu0 }
 0x4ce   : > { %v1494_v43 = vld [vmem:[%s2298_s6 + $0x18] sm:$0xff] }
 0x53a   : > { %v827_v44 = vpop.xlane.xlu0 %826 }
 0x53b   : > { %1970 = vrcp.f32 %v827_v44  ;;  %v1493_v44 = vld [vmem:[%s2298_s6 + $0x10] sm:$0xff] }
 0x53e   : > { %v984_v46 = vpop.permute.xlu0 %983 }
 0x542   : > { %v982_v48 = vpop.permute.xlu0 %981 }
 0x548   : > { %v1971_v45 = vpop.eup %1970 }
 0x549   : > { %v829_v47 = vmul.f32 %v1971_v45, %v1969_v40  ;;  %v1492_v45 = vld [vmem:[%s2298_s6 + $0x8] sm:$0xff] }
 0x54b   : > { %1876 = vmatmul.mubr.msk.f32.vlgmr.msra.gmra.mxu0 %vm494_vm2, %v829_v47 }
 0x54c   : > { %1884 = vmatpush3.xpose.msk.msra.mxu0 %vm494_vm2, %v984_v46  ;;  %1885 = vmatprep.mubr.msk.f32.mxu0 %vm1995_vm0, %v1994_v1  ;;  %v1491_v46 = vld [vmem:[%s2298_s6] sm:$0xff] }
 0x54d   : > { %1893 = vmatprep.subr.mxu0 %v1994_v1 }
 0x54f   : > { %1886 = vmatmul.mubr.msk.f32.vlgmr.msra.gmra.mxu0 %vm494_vm2, %v982_v48 }
 0x550   : > { %1895 = vmatprep.mubr.msk.f32.mxu0 %vm1995_vm0, %v1994_v1  ;;  %1894 = vmatpush3.msra.mxu0 %v1148_v5 }
 0x551   : > { %1903 = vmatprep.subr.mxu0 %v1994_v1 }
 0x60b   : > { %v902_v50 = vpop.f32.mrf.mxu0 }
 0x60c   : > { %1881 = vmatmul.mubr.msk.f32.vlgmr.msra.gmra.mxu1 %vm494_vm2, %v902_v50 }
 0x60d   : > { %v1877_v51 = vpop.f32.mrf.mxu0  ;;  %1890 = vmatprep.mubr.msk.f32.mxu1 %vm1995_vm0, %v1994_v1 }
 0x60e   : > { %v1789_v51 = vld [vmem:[%s2302_s10] ss:$0 sm:$0xff] }
 0x60f   : > { %v1055_v52 = vpop.f32.mrf.mxu0 }
 0x610   : > { %v1059_v53 = vmul.f32 0.35355338, %v1055_v52 }
 0x611   : > { %v1887_v54 = vpop.f32.mrf.mxu0 }
 0x612   : > { %v1060_v55 = vadd.f32 %v2130_v13, %v1059_v53  ;;  %v1790_v53 = vld [vmem:[%s2302_s10 + $0x1] ss:$0 sm:$0xff] }
 0x614   : > { %v1061_v56 = vsel %vm494_vm2, %v1060_v55, -inf }
 0x615   : > { %1062 = vmax.xlane.f32.xlu1 %v1061_v56  ;;  %v1591_v56 = vld [vmem:[%s2300_s8 + $0x38] sm:$0xff] }
 0x626   : > { %1072 = vrot.lane.b32.xlu1 %v2114_v8, %s2003_s12  ;;  %s395_s12 = scalar_lea.vmem %s2303_s11, %s1767_s25 }
 0x62a   : > { %1225 = vrot.lane.b32.xlu1 %v2114_v8, %s2004_s13 }
 0x62e   : > { %1223 = vrot.lane.b32.xlu1 %v2114_v8, %s2005_s14 }
 0x69e   : > { %v1063_v57 = vpop.xlane.xlu1 %1062 }
 0x69f   : > { %v1064_v58 = vsub.f32 %v1060_v55, %v1063_v57  ;;  %v1590_v57 = vld [vmem:[%s2300_s8 + $0x30] sm:$0xff] }
 0x6a1   : > { %v1065_v59 = vmul.f32 1.442695, %v1064_v58  ;;  %v1589_v58 = vld [vmem:[%s2300_s8 + $0x28] sm:$0xff] }
 0x6a2   : > { %v1073_v60 = vpop.permute.xlu1 %1072 }
 0x6a3   : > { %1972 = vpow2.f32 %v1065_v59  ;;  %1889 = vmatpush3.msra.mxu1 %v1073_v60  ;;  %v1588_v59 = vld [vmem:[%s2300_s8 + $0x20] sm:$0xff]  ;;  %v1587_v60 = vld [vmem:[%s2300_s8 + $0x18] sm:$0xff] }
 0x6a4   : > { %1898 = vmatprep.subr.mxu1 %v1994_v1 }
 0x6a6   : > { %v1226_v10 = vpop.permute.xlu1 %1225 }
 0x6aa   : > { %v1224_v12 = vpop.permute.xlu1 %1223 }
 0x6b0   : > { %v1973_v61 = vpop.eup %1972 }
 0x6b1   : > { %v1067_v62 = vsel %vm494_vm2, %v1973_v61, 0.0 }
 0x6b2   : > { %1068 = vadd.xlane.f32.xlu0 %v1067_v62  ;;  %v1585_v62 = vld [vmem:[%s2300_s8 + $0x8] sm:$0xff] }
 0x6cc   : > { %v976_v3 = vpop.f32.mrf.mxu1 }
 0x6cd   : > { %v980_v4 = vadd.f32 %v976_v3, %v738_v2 }
 0x6ce   : > { %v1882_v6 = vpop.f32.mrf.mxu1 }
 0x73b   : > { %v1069_v7 = vpop.xlane.xlu0 %1068 }
 0x73c   : > { %1974 = vrcp.f32 %v1069_v7 }
 0x749   : > { %v1975_v9 = vpop.eup %1974 }
 0x74a   : > { %v1071_v11 = vmul.f32 %v1975_v9, %v1973_v61  ;;  %v1586_v61 = vld [vmem:[%s2300_s8 + $0x10] sm:$0xff] }
 0x74c   : > { %1891 = vmatmul.mubr.msk.f32.vlgmr.msra.gmra.mxu1 %vm494_vm2, %v1071_v11 }
 0x74d   : > { %1899 = vmatpush3.xpose.msk.msra.mxu1 %vm494_vm2, %v1226_v10  ;;  %1900 = vmatprep.mubr.msk.f32.mxu1 %vm1995_vm0, %v1994_v1 }
 0x74e   : > { %1908 = vmatprep.subr.mxu1 %v1994_v1 }
 0x750   : > { %1901 = vmatmul.mubr.msk.f32.vlgmr.msra.gmra.mxu1 %vm494_vm2, %v1224_v12 }
 0x751   : > { %1910 = vmatprep.mubr.msk.f32.mxu1 %vm1995_vm0, %v1994_v1  ;;  %1909 = vmatpush3.msra.mxu1 %v1390_v27 }
 0x752   : > { %1924 = vmatprep.subr.mxu1 %v1994_v1 }
 0x80c   : > { %v1144_v14 = vpop.f32.mrf.mxu1 }
 0x80d   : > { %1896 = vmatmul.mubr.msk.f32.vlgmr.msra.gmra.mxu0 %vm494_vm2, %v1144_v14 }
 0x80e   : > { %v1892_v15 = vpop.f32.mrf.mxu1  ;;  %1905 = vmatprep.mubr.msk.f32.mxu0 %vm1995_vm0, %v1994_v1 }
 0x810   : > { %v1297_v16 = vpop.f32.mrf.mxu1 }
 0x811   : > { %v1301_v17 = vmul.f32 0.35355338, %v1297_v16 }
 0x812   : > { %v1902_v18 = vpop.f32.mrf.mxu1 }
 0x813   : > { %v1302_v19 = vadd.f32 %v2130_v13, %v1301_v17 }
 0x815   : > { %v1303_v20 = vsel %vm494_vm2, %v1302_v19, -inf }
 0x816   : > { %1304 = vmax.xlane.f32.xlu1 %v1303_v20 }
 0x89f   : > { %v1305_v21 = vpop.xlane.xlu1 %1304 }
 0x8a0   : > { %v1306_v22 = vsub.f32 %v1302_v19, %v1305_v21 }
 0x8a2   : > { %v1307_v23 = vmul.f32 1.442695, %v1306_v22 }
 0x8a4   : > { %1976 = vpow2.f32 %v1307_v23 }
 0x8b1   : > { %v1977_v24 = vpop.eup %1976 }
 0x8b2   : > { %v1309_v25 = vsel %vm494_vm2, %v1977_v24, 0.0 }
 0x8b3   : > { %1310 = vadd.xlane.f32.xlu0 %v1309_v25 }
 0x8c9   : > { %1314 = vrot.lane.b32.xlu0 %v2114_v8, %s2006_s21 }
 0x8cd   : > { %v1218_v26 = vpop.f32.mrf.mxu0 }
 0x8ce   : > { %v1222_v13 = vadd.f32 %v1218_v26, %v980_v4 }
 0x8cf   : > { %v1897_v28 = vpop.f32.mrf.mxu0 }
 0x93c   : > { %v1311_v29 = vpop.xlane.xlu0 %1310 }
 0x93d   : > { %1978 = vrcp.f32 %v1311_v29  ;;  %v1795_v29 = vld [vmem:[%s2302_s10 + $0x2] ss:$0 sm:$0xff] }
 0x940   : > { %v1315_v30 = vpop.permute.xlu0 %1314 }
 0x941   : > { %1904 = vmatpush3.msra.mxu0 %v1315_v30 }
 0x942   : > { %1913 = vmatprep.subr.mxu0 %v1994_v1 }
 0x94a   : > { %v1979_v31 = vpop.eup %1978 }
 0x94b   : > { %v1313_v32 = vmul.f32 %v1979_v31, %v1977_v24  ;;  %v1796_v31 = vld [vmem:[%s2302_s10 + $0x3] ss:$0 sm:$0xff] }
 0x94d   : > { %1906 = vmatmul.mubr.msk.f32.vlgmr.msra.gmra.mxu0 %vm494_vm2, %v1313_v32 }
 0x94e   : > { %1921 = vmatprep.mubr.msk.f32.mxu0 %vm1995_vm0, %v1994_v1  ;;  %1914 = vmatpush3.msra.mxu0 %v1494_v43 }
 0x94f   : > { %1915 = vmatprep.subr.mxu0 %v1994_v1 }
 0x950   : > { %1916 = vmatpush3.msra.mxu0 %v1493_v44 }
 0x951   : > { %1917 = vmatprep.subr.mxu0 %v1994_v1 }
 0x952   : > { %1918 = vmatpush3.msra.mxu0 %v1492_v45 }
 0x953   : > { %1919 = vmatprep.subr.mxu0 %v1994_v1 }
 0x954   : > { %1920 = vmatpush3.msra.mxu0 %v1491_v46 }
 0xa0d   : > { %v1386_v8 = vpop.f32.mrf.mxu0 }
 0xa0e   : > { %1911 = vmatmul.mubr.msk.f32.vlgmr.msra.gmra.mxu1 %vm494_vm2, %v1386_v8 }
 0xa0f   : > { %v1907_v33 = vpop.f32.mrf.mxu0  ;;  %1940 = vmatprep.mubr.msk.f32.mxu1 %vm1995_vm0, %v1994_v1  ;;  %1925 = vmatpush3.msra.mxu1 %v1591_v56 }
 0xa10   : > { %1926 = vmatprep.subr.mxu1 %v1994_v1 }
 0xa11   : > { %1927 = vmatpush3.msra.mxu1 %v1590_v57 }
 0xa12   : > { %1928 = vmatprep.subr.mxu1 %v1994_v1 }
 0xa13   : > { %1929 = vmatpush3.msra.mxu1 %v1589_v58 }
 0xa14   : > { %1930 = vmatprep.subr.mxu1 %v1994_v1 }
 0xa15   : > { %1931 = vmatpush3.msra.mxu1 %v1588_v59 }
 0xa16   : > { %1932 = vmatprep.subr.mxu1 %v1994_v1 }
 0xa17   : > { %1933 = vmatpush3.msra.mxu1 %v1587_v60 }
 0xa18   : > { %1934 = vmatprep.subr.mxu1 %v1994_v1 }
 0xa19   : > { %1935 = vmatpush3.msra.mxu1 %v1586_v61 }
 0xa1a   : > { %1936 = vmatprep.subr.mxu1 %v1994_v1 }
 0xa1b   : > { %1937 = vmatpush3.msra.mxu1 %v1585_v62 }
 0xa1c   : > { %1938 = vmatprep.subr.mxu1 %v1994_v1  ;;  %v1793_v1 = vld [vmem:[%s2301_s9] ss:$0 sm:$0xff] }
 0xa1d   : > { %1939 = vmatpush3.msra.mxu1 %v1584_v63 }
 0xace   : > { %v1460_v34 = vpop.f32.mrf.mxu1 }
 0xacf   : > { %v1464_v35 = vadd.f32 %v1460_v34, %v1222_v13 }
 0xad0   : > { %v1912_v36 = vpop.f32.mrf.mxu1 }
 0xad1   : > { %v1467_v37 = vsel %vm408_vm1, %v1464_v35, 0.0 }
 0xad2   : > { %1468 = vadd.xlane.f32.xlu0 %v1467_v37 }
 0xb5b   : > { %v1469_v38 = vpop.xlane.xlu0 %1468 }
 0xb5c   : > { %v1471_v39 = vmul.f32 0.03125, %v1469_v38 }
 0xb5e   : > { %v1472_v40 = vsub.f32 %v1464_v35, %v1471_v39 }
 0xb60   : > { %v1473_v41 = vmul.f32 %v1472_v40, %v1472_v40 }
 0xb62   : > { %v1474_v42 = vsel %vm408_vm1, %v1473_v41, 0.0 }
 0xb63   : > { %1475 = vadd.xlane.f32.xlu1 %v1474_v42 }
 0xbec   : > { %v1476_v47 = vpop.xlane.xlu1 %1475 }
 0xbed   : > { %v1477_v48 = vmul.f32 0.03125, %v1476_v47 }
 0xbef   : > { %v1478_v49 = vadd.f32 1e-12, %v1477_v48 }
 0xbf1   : > { %1980 = vrsqrt.f32 %v1478_v49 }
 0xbfe   : > { %v1981_v50 = vpop.eup %1980 }
 0xbff   : > { %v1480_v52 = vmul.f32 %v1981_v50, %v1472_v40 }
 0xc01   : > { %v1485_v54 = vmul.f32 %v1789_v51, %v1480_v52 }
 0xc03   : > { %v1490_v55 = vadd.f32 %v1790_v53, %v1485_v54 }
 0xc05   : > { %1922 = vmatmul.mubr.msk.f32.vlgmr.msra.gmra.mxu0 %vm408_vm1, %v1490_v55 }
 0xcc5   : > { %v1571_v2 = vpop.f32.mrf.mxu0 }
 0xcc6   : > { %v1572_v3 = vadd.f32 %v1791_v0, %v1571_v2 }
 0xcc7   : > { %v1923_v4 = vpop.f32.mrf.mxu0 }
 0xcc8   : > { %v1576_v6 = vmul.f32 0.044715, %v1572_v3  ;;  %v1575_v5 = vmul.f32 0.5, %v1572_v3 }
 0xcca   : > { %v1577_v7 = vmul.f32 %v1576_v6, %v1572_v3 }
 0xccc   : > { %v1578_v9 = vmul.f32 %v1577_v7, %v1572_v3 }
 0xcce   : > { %v1579_v10 = vadd.f32 %v1578_v9, %v1572_v3 }
 0xcd0   : > { %v1580_v11 = vmul.f32 0.7978846, %v1579_v10 }
 0xcd2   : > { %1982 = vtanh.f32 %v1580_v11 }
 0xcdf   : > { %v1983_v12 = vpop.eup %1982 }
 0xce0   : > { %v1582_v14 = vadd.f32 1.0, %v1983_v12 }
 0xce2   : > { %v1583_v15 = vmul.f32 %v1582_v14, %v1575_v5 }
 0xce4   : > { %1941 = vmatmul.mubr.msk.f32.vlgmr.msra.gmra.mxu1 %vm1599_vm3, %v1583_v15 }
 0xda4   : > { %v1669_v16 = vpop.f32.mrf.mxu1 }
 0xda5   : > { %v1670_v17 = vadd.f32 %v1793_v1, %v1669_v16 }
 0xda6   : > { %v1942_v18 = vpop.f32.mrf.mxu1 }
 0xda7   : > { %v1673_v19 = vadd.f32 %v1670_v17, %v1490_v55 }
 0xda9   : > { %v1676_v20 = vsel %vm408_vm1, %v1673_v19, 0.0 }
 0xdaa   : > { %1677 = vadd.xlane.f32.xlu1 %v1676_v20 }
 0xe33   : > { %v1678_v21 = vpop.xlane.xlu1 %1677 }
 0xe34   : > { %v1679_v22 = vmul.f32 0.03125, %v1678_v21 }
 0xe36   : > { %v1680_v23 = vsub.f32 %v1673_v19, %v1679_v22 }
 0xe38   : > { %v1681_v24 = vmul.f32 %v1680_v23, %v1680_v23 }
 0xe3a   : > { %v1682_v25 = vsel %vm408_vm1, %v1681_v24, 0.0 }
 0xe3b   : > { %1683 = vadd.xlane.f32.xlu1 %v1682_v25 }
 0xec4   : > { %v1684_v26 = vpop.xlane.xlu1 %1683 }
 0xec5   : > { %v1685_v27 = vmul.f32 0.03125, %v1684_v26 }
 0xec7   : > { %v1686_v13 = vadd.f32 1e-12, %v1685_v27 }
 0xec9   : > { %1984 = vrsqrt.f32 %v1686_v13 }
 0xed6   : > { %v1985_v28 = vpop.eup %1984 }
 0xed7   : > { %v1688_v30 = vmul.f32 %v1985_v28, %v1680_v23 }
 0xed9   : > { %v1693_v32 = vmul.f32 %v1795_v29, %v1688_v30 }
 0xedb   : > { %v1698_v8 = vadd.f32 %v1796_v31, %v1693_v32 }
 0xedd   : > { %1699 = vst.msk [vmem:[%s395_s12] sm:$0xff] %vm408_vm1, %v1698_v8 }
 0xede PF: > { %s21_s17 = sadd.s32 1, %s1992_s17  }
 0xedf   : > { %p18_p4 = scmp.ge.s32.totalorder %s21_s17, 4  }
 0xee1   :  { %20 = sbr.rel (!%p18_p4) target bundleno = 1 (0x1), region = 97 }

</bundles_post_ra>
